<compile_context>
chip_gen: v5e
topology: v5e:2x2
jax: 0.10.0
libtpu: 0.0.40
codegen_flags: <defaults>
</compile_context>

<pallas_src>
import math
import functools

import jax
import jax.numpy as jnp
from jax import lax
from jax.experimental import pallas as pl
from jax.experimental.pallas import tpu as pltpu

# ---------------- small config (consistent with the module) ----------------
BATCH = 2
SEQ = 8
HIDDEN = 64
NUM_HEADS = 4
NUM_KV_HEADS = 2
HEAD_DIM = HIDDEN // NUM_HEADS          # 16
INTERMEDIATE = 128
N_REP = NUM_HEADS // NUM_KV_HEADS       # GQA repeat factor
RMS_EPS = 1e-6
ROPE_THETA = 10000.0

NEG_INF = -1e30                         # plain Python float (not captured array)


# =============================== fused kernel ==============================

def decoder_layer_kernel(x_ref, ln_in_ref, ln_post_ref, wqkv_ref, wo_ref,
                         wgu_ref, wd_ref, cos_ref, sin_ref, o_ref, *,
                         num_heads, num_kv_heads, head_dim, intermediate, eps):
    """One grid step = one batch element. Everything stays in VMEM/vregs."""
    n_rep = num_heads // num_kv_heads
    x = x_ref[0].astype(jnp.float32)                       # (S, H)
    seq = x.shape[0]

    # ---- RMSNorm (input_layernorm), f32 math -------------------------------
    var = jnp.mean(x * x, axis=-1, keepdims=True)
    h1 = (x * lax.rsqrt(var + eps)) * ln_in_ref[...].astype(jnp.float32)

    # ---- fused QKV projection (weights already [in, out]) ------------------
    qkv = jnp.dot(h1, wqkv_ref[...],
                  preferred_element_type=jnp.float32)      # (S, NH*D + 2*NKV*D)

    cos = cos_ref[...]                                      # (S, D)
    sin = sin_ref[...]
    half = head_dim // 2
    scale = 1.0 / math.sqrt(head_dim)
    k_base = num_heads * head_dim
    v_base = k_base + num_kv_heads * head_dim

    def rope(t):                                            # t: (S, D)
        # TODO(synk): pltpu.roll + sign-folded sin would move this to the XLU
        # slot on HW; concatenate form kept for interpret-mode portability.
        t_rot = jnp.concatenate([-t[:, half:], t[:, :half]], axis=-1)
        return t * cos + t_rot * sin

    # RoPE'd K and raw V for each KV head (RoPE is per-position, so applying
    # it once per KV head is equivalent to the reference's rotate-then-repeat)
    k_heads, v_heads = [], []
    for g in range(num_kv_heads):
        kh = qkv[:, k_base + g * head_dim:k_base + (g + 1) * head_dim]
        k_heads.append(rope(kh))
        v_heads.append(qkv[:, v_base + g * head_dim:v_base + (g + 1) * head_dim])

    # causal mask (attention_mask=None path of the reference)
    row = lax.broadcasted_iota(jnp.int32, (seq, seq), 0)
    col = lax.broadcasted_iota(jnp.int32, (seq, seq), 1)
    keep = col <= row

    dn = (((1,), (1,)), ((), ()))        # q @ k^T without materializing k.T

    head_outs = []
    for hh in range(num_heads):          # static unroll: NUM_HEADS = 4
        g = hh // n_rep                  # GQA group
        qh = rope(qkv[:, hh * head_dim:(hh + 1) * head_dim]) * scale
        scores = lax.dot_general(qh, k_heads[g], dn,
                                 preferred_element_type=jnp.float32)   # (S, S)
        scores = jnp.where(keep, scores, NEG_INF)
        m = jnp.max(scores, axis=-1, keepdims=True)
        p = jnp.exp(scores - m)
        p = p * (1.0 / jnp.sum(p, axis=-1, keepdims=True))
        head_outs.append(jnp.dot(p, v_heads[g],
                                 preferred_element_type=jnp.float32))  # (S, D)

    attn = jnp.concatenate(head_outs, axis=-1)                         # (S, NH*D)

    # ---- output projection + residual 1 ------------------------------------
    x1 = x + jnp.dot(attn, wo_ref[...], preferred_element_type=jnp.float32)

    # ---- RMSNorm (post_attention_layernorm) ---------------------------------
    var2 = jnp.mean(x1 * x1, axis=-1, keepdims=True)
    h2 = (x1 * lax.rsqrt(var2 + eps)) * ln_post_ref[...].astype(jnp.float32)

    # ---- SwiGLU MLP (fused gate|up) + residual 2 ----------------------------
    gu = jnp.dot(h2, wgu_ref[...], preferred_element_type=jnp.float32)  # (S, 2I)
    g_ = gu[:, :intermediate]
    u_ = gu[:, intermediate:]
    hmlp = (g_ * jax.nn.sigmoid(g_)) * u_                                # SiLU(g)*u
    mlp_out = jnp.dot(hmlp, wd_ref[...], preferred_element_type=jnp.float32)

    o_ref[0] = (x1 + mlp_out).astype(o_ref.dtype)


# ============================== wrapper ====================================

def rope_cos_sin(seq_len, dim, theta):
    inv_freq = 1.0 / (theta ** (jnp.arange(0, dim, 2, dtype=jnp.float32) / dim))
    t = jnp.arange(seq_len, dtype=jnp.float32)[:, None]
    freqs = t * inv_freq[None, :]
    freqs = jnp.concatenate([freqs, freqs], axis=-1)
    return jnp.cos(freqs), jnp.sin(freqs)


@jax.jit
def decoder_layer(x, params):
    # TODO(synk): kv-cache path and attention dropout are unused in the
    # reference forward (use_kv_cache=False, dropout=0) and are not implemented.
    b, s, h = x.shape
    d = HEAD_DIM

    # One-time (XLA-side) weight fusion + transpose to [in, out] so the kernel
    # does lane-dense matmuls and never transposes a weight in VMEM.
    wqkv = jnp.concatenate([params["wq"], params["wk"], params["wv"]], axis=0).T
    wo = params["wo"].T
    wgu = jnp.concatenate([params["wg"], params["wu"]], axis=0).T
    wd = params["wd"].T
    ln_in = params["ln_in"].reshape(1, h)
    ln_post = params["ln_post"].reshape(1, h)
    cos, sin = rope_cos_sin(s, d, ROPE_THETA)

    qkv_out = NUM_HEADS * d + 2 * NUM_KV_HEADS * d          # 128

    kernel = functools.partial(
        decoder_layer_kernel,
        num_heads=NUM_HEADS, num_kv_heads=NUM_KV_HEADS, head_dim=d,
        intermediate=INTERMEDIATE, eps=RMS_EPS)

    return pl.pallas_call(
        kernel,
        out_shape=jax.ShapeDtypeStruct((b, s, h), x.dtype),
        grid=(b,),
        in_specs=[
            pl.BlockSpec((1, s, h), lambda i: (i, 0, 0)),            # x (per batch)
            pl.BlockSpec((1, h), lambda i: (0, 0)),                  # ln_in
            pl.BlockSpec((1, h), lambda i: (0, 0)),                  # ln_post
            pl.BlockSpec((h, qkv_out), lambda i: (0, 0)),            # W_qkv [in,out]
            pl.BlockSpec((NUM_HEADS * d, h), lambda i: (0, 0)),      # W_o   [in,out]
            pl.BlockSpec((h, 2 * INTERMEDIATE), lambda i: (0, 0)),   # W_gate|up
            pl.BlockSpec((INTERMEDIATE, h), lambda i: (0, 0)),       # W_down
            pl.BlockSpec((s, d), lambda i: (0, 0)),                  # cos
            pl.BlockSpec((s, d), lambda i: (0, 0)),                  # sin
        ],
        out_specs=pl.BlockSpec((1, s, h), lambda i: (i, 0, 0)),
        compiler_params=pltpu.CompilerParams(
            dimension_semantics=("parallel",)),   # batch splits across v7x cores
    )(x, ln_in, ln_post, wqkv, wo, wgu, wd, cos, sin)


# ============================ pure-JAX reference ===========================

def reference(x, params):
    def rms(t, w):
        tf = t.astype(jnp.float32)
        var = jnp.mean(tf * tf, axis=-1, keepdims=True)
        return (w * (tf * lax.rsqrt(var + RMS_EPS))).astype(t.dtype)

    def rot(t):
        d = t.shape[-1]
        return jnp.concatenate([-t[..., d // 2:], t[..., : d // 2]], axis=-1)

    b, s, _ = x.shape
    h1 = rms(x, params["ln_in"])
    q = (h1 @ params["wq"].T).reshape(b, s, NUM_HEADS, HEAD_DIM)
    k = (h1 @ params["wk"].T).reshape(b, s, NUM_KV_HEADS, HEAD_DIM)
    v = (h1 @ params["wv"].T).reshape(b, s, NUM_KV_HEADS, HEAD_DIM)

    cos, sin = rope_cos_sin(s, HEAD_DIM, ROPE_THETA)
    cos_, sin_ = cos[None, :, None, :], sin[None, :, None, :]
    q = q * cos_ + rot(q) * sin_
    k = k * cos_ + rot(k) * sin_

    k = jnp.repeat(k, N_REP, axis=2)
    v = jnp.repeat(v, N_REP, axis=2)
    q, k, v = (jnp.transpose(t, (0, 2, 1, 3)) for t in (q, k, v))

    scores = q @ jnp.swapaxes(k, -1, -2) / math.sqrt(HEAD_DIM)
    mask = jnp.triu(jnp.full((s, s), -jnp.inf, jnp.float32), k=1)
    scores = scores + mask[None, None]
    p = jax.nn.softmax(scores.astype(jnp.float32), axis=-1).astype(q.dtype)

    attn = jnp.transpose(p @ v, (0, 2, 1, 3)).reshape(b, s, -1)
    attn = attn @ params["wo"].T
    x1 = x + attn

    h2 = rms(x1, params["ln_post"])
    g = h2 @ params["wg"].T
    u = h2 @ params["wu"].T
    mlp_o = (jax.nn.silu(g) * u) @ params["wd"].T
    return x1 + mlp_o


# ================================== main ===================================

if __name__ == "__main__":
    key = jax.random.PRNGKey(0)
    keys = jax.random.split(key, 8)
    scale = 0.05
    params = {
        "ln_in": jnp.ones((HIDDEN,), jnp.float32),
        "ln_post": jnp.ones((HIDDEN,), jnp.float32),
        "wq": jax.random.normal(keys[0], (NUM_HEADS * HEAD_DIM, HIDDEN), jnp.float32) * scale,
        "wk": jax.random.normal(keys[1], (NUM_KV_HEADS * HEAD_DIM, HIDDEN), jnp.float32) * scale,
        "wv": jax.random.normal(keys[2], (NUM_KV_HEADS * HEAD_DIM, HIDDEN), jnp.float32) * scale,
        "wo": jax.random.normal(keys[3], (HIDDEN, NUM_HEADS * HEAD_DIM), jnp.float32) * scale,
        "wg": jax.random.normal(keys[4], (INTERMEDIATE, HIDDEN), jnp.float32) * scale,
        "wu": jax.random.normal(keys[5], (INTERMEDIATE, HIDDEN), jnp.float32) * scale,
        "wd": jax.random.normal(keys[6], (HIDDEN, INTERMEDIATE), jnp.float32) * scale,
    }
    x = jax.random.normal(keys[7], (BATCH, SEQ, HIDDEN), jnp.float32)

    out = decoder_layer(x, params)
    out = jax.block_until_ready(out)

    ref = reference(x, params)
    assert out.shape == (BATCH, SEQ, HIDDEN), out.shape
    assert jnp.allclose(out, ref, atol=1e-2, rtol=1e-2), float(jnp.max(jnp.abs(out - ref)))

    print("KERNEL_OK")
</pallas_src>

<mosaic_0001>
module attributes {stable_mosaic.version = 11 : i64} {
  func.func @decoder_layer_kernel(%arg0: i32, %arg1: memref<1x8x64xf32, #tpu.memory_space<vmem>>, %arg2: memref<1x64xf32, #tpu.memory_space<vmem>>, %arg3: memref<1x64xf32, #tpu.memory_space<vmem>>, %arg4: memref<64x128xf32, #tpu.memory_space<vmem>>, %arg5: memref<64x64xf32, #tpu.memory_space<vmem>>, %arg6: memref<64x256xf32, #tpu.memory_space<vmem>>, %arg7: memref<128x64xf32, #tpu.memory_space<vmem>>, %arg8: memref<8x16xf32, #tpu.memory_space<vmem>>, %arg9: memref<8x16xf32, #tpu.memory_space<vmem>>, %arg10: memref<1x8x64xf32, #tpu.memory_space<vmem>>) attributes {dimension_semantics = [#tpu.dimension_semantics<parallel>], iteration_bounds = array<i64: 2>, scalar_prefetch = 0 : i64, scratch_operands = 0 : i64, tpu.core_type = #tpu.core_type<tc>, window_params = [{transform_indices = @transform_0, window_bounds = array<i64: 1, 8, 64>}, {pipeline_mode = #tpu.pipeline_mode<synchronous>, transform_indices = @transform_1, window_bounds = array<i64: 1, 64>}, {pipeline_mode = #tpu.pipeline_mode<synchronous>, transform_indices = @transform_2, window_bounds = array<i64: 1, 64>}, {pipeline_mode = #tpu.pipeline_mode<synchronous>, transform_indices = @transform_3, window_bounds = array<i64: 64, 128>}, {pipeline_mode = #tpu.pipeline_mode<synchronous>, transform_indices = @transform_4, window_bounds = array<i64: 64, 64>}, {pipeline_mode = #tpu.pipeline_mode<synchronous>, transform_indices = @transform_5, window_bounds = array<i64: 64, 256>}, {pipeline_mode = #tpu.pipeline_mode<synchronous>, transform_indices = @transform_6, window_bounds = array<i64: 128, 64>}, {pipeline_mode = #tpu.pipeline_mode<synchronous>, transform_indices = @transform_7, window_bounds = array<i64: 8, 16>}, {pipeline_mode = #tpu.pipeline_mode<synchronous>, transform_indices = @transform_8, window_bounds = array<i64: 8, 16>}, {transform_indices = @transform_9, window_bounds = array<i64: 1, 8, 64>}]} {
    %c0 = arith.constant 0 : index
    %c0_0 = arith.constant 0 : index
    %c0_1 = arith.constant 0 : index
    %0 = vector.load %arg1[%c0, %c0_0, %c0_1] : memref<1x8x64xf32, #tpu.memory_space<vmem>>, vector<1x8x64xf32>
    %1 = vector.shape_cast %0 : vector<1x8x64xf32> to vector<8x64xf32>
    %2 = arith.mulf %1, %1 : vector<8x64xf32>
    %cst = arith.constant dense<0.000000e+00> : vector<8xf32>
    %3 = vector.multi_reduction <add>, %2, %cst [1] : vector<8x64xf32> to vector<8xf32>
    %4 = vector.shape_cast %3 : vector<8xf32> to vector<8x1xf32>
    %cst_2 = arith.constant 6.400000e+01 : f32
    %5 = vector.broadcast %cst_2 : f32 to vector<8x1xf32>
    %6 = arith.divf %4, %5 : vector<8x1xf32>
    %cst_3 = arith.constant 9.99999997E-7 : f32
    %7 = vector.broadcast %cst_3 : f32 to vector<8x1xf32>
    %8 = arith.addf %6, %7 : vector<8x1xf32>
    %9 = math.rsqrt %8 : vector<8x1xf32>
    %10 = vector.broadcast %9 : vector<8x1xf32> to vector<8x64xf32>
    %11 = arith.mulf %1, %10 : vector<8x64xf32>
    %c0_4 = arith.constant 0 : index
    %c0_5 = arith.constant 0 : index
    %12 = vector.load %arg2[%c0_4, %c0_5] : memref<1x64xf32, #tpu.memory_space<vmem>>, vector<1x64xf32>
    %13 = vector.broadcast %12 : vector<1x64xf32> to vector<8x64xf32>
    %14 = arith.mulf %11, %13 : vector<8x64xf32>
    %c0_6 = arith.constant 0 : index
    %c0_7 = arith.constant 0 : index
    %15 = vector.load %arg4[%c0_6, %c0_7] : memref<64x128xf32, #tpu.memory_space<vmem>>, vector<64x128xf32>
    %cst_8 = arith.constant dense<0.000000e+00> : vector<8x128xf32>
    %16 = tpu.matmul %14, %15, %cst_8 {dimension_numbers = #tpu.dot_dimension_numbers<[1], [0], [0], [1], [0, 0, 1, 1], [], []>} : vector<8x64xf32>, vector<64x128xf32>, vector<8x128xf32> -> vector<8x128xf32>
    %c0_9 = arith.constant 0 : index
    %c0_10 = arith.constant 0 : index
    %17 = vector.load %arg8[%c0_9, %c0_10] : memref<8x16xf32, #tpu.memory_space<vmem>>, vector<8x16xf32>
    %c0_11 = arith.constant 0 : index
    %c0_12 = arith.constant 0 : index
    %18 = vector.load %arg9[%c0_11, %c0_12] : memref<8x16xf32, #tpu.memory_space<vmem>>, vector<8x16xf32>
    %19 = vector.extract_strided_slice %16 {offsets = [0, 64], sizes = [8, 16], strides = [1, 1]} : vector<8x128xf32> to vector<8x16xf32>
    %20 = vector.extract_strided_slice %19 {offsets = [0, 8], sizes = [8, 8], strides = [1, 1]} : vector<8x16xf32> to vector<8x8xf32>
    %cst_13 = arith.constant 0.000000e+00 : f32
    %21 = vector.broadcast %cst_13 : f32 to vector<8x8xf32>
    %22 = arith.subf %21, %20 : vector<8x8xf32>
    %23 = vector.extract_strided_slice %19 {offsets = [0, 0], sizes = [8, 8], strides = [1, 1]} : vector<8x16xf32> to vector<8x8xf32>
    %24 = tpu.concatenate %22, %23 in 1 : vector<8x8xf32>, vector<8x8xf32> -> vector<8x16xf32>
    %25 = arith.mulf %19, %17 : vector<8x16xf32>
    %26 = arith.mulf %24, %18 : vector<8x16xf32>
    %27 = arith.addf %25, %26 : vector<8x16xf32>
    %28 = vector.extract_strided_slice %16 {offsets = [0, 96], sizes = [8, 16], strides = [1, 1]} : vector<8x128xf32> to vector<8x16xf32>
    %29 = vector.extract_strided_slice %16 {offsets = [0, 80], sizes = [8, 16], strides = [1, 1]} : vector<8x128xf32> to vector<8x16xf32>
    %30 = vector.extract_strided_slice %29 {offsets = [0, 8], sizes = [8, 8], strides = [1, 1]} : vector<8x16xf32> to vector<8x8xf32>
    %cst_14 = arith.constant 0.000000e+00 : f32
    %31 = vector.broadcast %cst_14 : f32 to vector<8x8xf32>
    %32 = arith.subf %31, %30 : vector<8x8xf32>
    %33 = vector.extract_strided_slice %29 {offsets = [0, 0], sizes = [8, 8], strides = [1, 1]} : vector<8x16xf32> to vector<8x8xf32>
    %34 = tpu.concatenate %32, %33 in 1 : vector<8x8xf32>, vector<8x8xf32> -> vector<8x16xf32>
    %35 = arith.mulf %29, %17 : vector<8x16xf32>
    %36 = arith.mulf %34, %18 : vector<8x16xf32>
    %37 = arith.addf %35, %36 : vector<8x16xf32>
    %38 = vector.extract_strided_slice %16 {offsets = [0, 112], sizes = [8, 16], strides = [1, 1]} : vector<8x128xf32> to vector<8x16xf32>
    %39 = tpu.iota {dimensions = array<i32: 0>} : vector<8x8xi32>
    %40 = tpu.iota {dimensions = array<i32: 1>} : vector<8x8xi32>
    %41 = arith.cmpi sle, %40, %39 : vector<8x8xi32>
    %42 = vector.extract_strided_slice %16 {offsets = [0, 0], sizes = [8, 16], strides = [1, 1]} : vector<8x128xf32> to vector<8x16xf32>
    %43 = vector.extract_strided_slice %42 {offsets = [0, 8], sizes = [8, 8], strides = [1, 1]} : vector<8x16xf32> to vector<8x8xf32>
    %cst_15 = arith.constant 0.000000e+00 : f32
    %44 = vector.broadcast %cst_15 : f32 to vector<8x8xf32>
    %45 = arith.subf %44, %43 : vector<8x8xf32>
    %46 = vector.extract_strided_slice %42 {offsets = [0, 0], sizes = [8, 8], strides = [1, 1]} : vector<8x16xf32> to vector<8x8xf32>
    %47 = tpu.concatenate %45, %46 in 1 : vector<8x8xf32>, vector<8x8xf32> -> vector<8x16xf32>
    %48 = arith.mulf %42, %17 : vector<8x16xf32>
    %49 = arith.mulf %47, %18 : vector<8x16xf32>
    %50 = arith.addf %48, %49 : vector<8x16xf32>
    %cst_16 = arith.constant 2.500000e-01 : f32
    %51 = vector.broadcast %cst_16 : f32 to vector<8x16xf32>
    %52 = arith.mulf %50, %51 : vector<8x16xf32>
    %cst_17 = arith.constant dense<0.000000e+00> : vector<8x8xf32>
    %53 = tpu.matmul %52, %27, %cst_17 {dimension_numbers = #tpu.dot_dimension_numbers<[1], [1], [0], [0], [0, 0, 1, 0], [], []>} : vector<8x16xf32>, vector<8x16xf32>, vector<8x8xf32> -> vector<8x8xf32>
    %cst_18 = arith.constant -1.000000e+30 : f32
    %54 = vector.broadcast %cst_18 : f32 to vector<8x8xf32>
    %55 = arith.select %41, %53, %54 : vector<8x8xi1>, vector<8x8xf32>
    %cst_19 = arith.constant dense<0xFF800000> : vector<8xf32>
    %56 = vector.multi_reduction <maximumf>, %55, %cst_19 [1] : vector<8x8xf32> to vector<8xf32>
    %57 = vector.shape_cast %56 : vector<8xf32> to vector<8x1xf32>
    %58 = vector.broadcast %57 : vector<8x1xf32> to vector<8x8xf32>
    %59 = arith.subf %55, %58 : vector<8x8xf32>
    %60 = math.exp %59 : vector<8x8xf32>
    %cst_20 = arith.constant dense<0.000000e+00> : vector<8xf32>
    %61 = vector.multi_reduction <add>, %60, %cst_20 [1] : vector<8x8xf32> to vector<8xf32>
    %62 = vector.shape_cast %61 : vector<8xf32> to vector<8x1xf32>
    %cst_21 = arith.constant 1.000000e+00 : f32
    %63 = vector.broadcast %cst_21 : f32 to vector<8x1xf32>
    %64 = arith.divf %63, %62 : vector<8x1xf32>
    %65 = vector.broadcast %64 : vector<8x1xf32> to vector<8x8xf32>
    %66 = arith.mulf %60, %65 : vector<8x8xf32>
    %cst_22 = arith.constant dense<0.000000e+00> : vector<8x16xf32>
    %67 = tpu.matmul %66, %28, %cst_22 {dimension_numbers = #tpu.dot_dimension_numbers<[1], [0], [0], [1], [0, 0, 1, 1], [], []>} : vector<8x8xf32>, vector<8x16xf32>, vector<8x16xf32> -> vector<8x16xf32>
    %68 = vector.extract_strided_slice %16 {offsets = [0, 16], sizes = [8, 16], strides = [1, 1]} : vector<8x128xf32> to vector<8x16xf32>
    %69 = vector.extract_strided_slice %68 {offsets = [0, 8], sizes = [8, 8], strides = [1, 1]} : vector<8x16xf32> to vector<8x8xf32>
    %cst_23 = arith.constant 0.000000e+00 : f32
    %70 = vector.broadcast %cst_23 : f32 to vector<8x8xf32>
    %71 = arith.subf %70, %69 : vector<8x8xf32>
    %72 = vector.extract_strided_slice %68 {offsets = [0, 0], sizes = [8, 8], strides = [1, 1]} : vector<8x16xf32> to vector<8x8xf32>
    %73 = tpu.concatenate %71, %72 in 1 : vector<8x8xf32>, vector<8x8xf32> -> vector<8x16xf32>
    %74 = arith.mulf %68, %17 : vector<8x16xf32>
    %75 = arith.mulf %73, %18 : vector<8x16xf32>
    %76 = arith.addf %74, %75 : vector<8x16xf32>
    %cst_24 = arith.constant 2.500000e-01 : f32
    %77 = vector.broadcast %cst_24 : f32 to vector<8x16xf32>
    %78 = arith.mulf %76, %77 : vector<8x16xf32>
    %cst_25 = arith.constant dense<0.000000e+00> : vector<8x8xf32>
    %79 = tpu.matmul %78, %27, %cst_25 {dimension_numbers = #tpu.dot_dimension_numbers<[1], [1], [0], [0], [0, 0, 1, 0], [], []>} : vector<8x16xf32>, vector<8x16xf32>, vector<8x8xf32> -> vector<8x8xf32>
    %cst_26 = arith.constant -1.000000e+30 : f32
    %80 = vector.broadcast %cst_26 : f32 to vector<8x8xf32>
    %81 = arith.select %41, %79, %80 : vector<8x8xi1>, vector<8x8xf32>
    %cst_27 = arith.constant dense<0xFF800000> : vector<8xf32>
    %82 = vector.multi_reduction <maximumf>, %81, %cst_27 [1] : vector<8x8xf32> to vector<8xf32>
    %83 = vector.shape_cast %82 : vector<8xf32> to vector<8x1xf32>
    %84 = vector.broadcast %83 : vector<8x1xf32> to vector<8x8xf32>
    %85 = arith.subf %81, %84 : vector<8x8xf32>
    %86 = math.exp %85 : vector<8x8xf32>
    %cst_28 = arith.constant dense<0.000000e+00> : vector<8xf32>
    %87 = vector.multi_reduction <add>, %86, %cst_28 [1] : vector<8x8xf32> to vector<8xf32>
    %88 = vector.shape_cast %87 : vector<8xf32> to vector<8x1xf32>
    %cst_29 = arith.constant 1.000000e+00 : f32
    %89 = vector.broadcast %cst_29 : f32 to vector<8x1xf32>
    %90 = arith.divf %89, %88 : vector<8x1xf32>
    %91 = vector.broadcast %90 : vector<8x1xf32> to vector<8x8xf32>
    %92 = arith.mulf %86, %91 : vector<8x8xf32>
    %cst_30 = arith.constant dense<0.000000e+00> : vector<8x16xf32>
    %93 = tpu.matmul %92, %28, %cst_30 {dimension_numbers = #tpu.dot_dimension_numbers<[1], [0], [0], [1], [0, 0, 1, 1], [], []>} : vector<8x8xf32>, vector<8x16xf32>, vector<8x16xf32> -> vector<8x16xf32>
    %94 = vector.extract_strided_slice %16 {offsets = [0, 32], sizes = [8, 16], strides = [1, 1]} : vector<8x128xf32> to vector<8x16xf32>
    %95 = vector.extract_strided_slice %94 {offsets = [0, 8], sizes = [8, 8], strides = [1, 1]} : vector<8x16xf32> to vector<8x8xf32>
    %cst_31 = arith.constant 0.000000e+00 : f32
    %96 = vector.broadcast %cst_31 : f32 to vector<8x8xf32>
    %97 = arith.subf %96, %95 : vector<8x8xf32>
    %98 = vector.extract_strided_slice %94 {offsets = [0, 0], sizes = [8, 8], strides = [1, 1]} : vector<8x16xf32> to vector<8x8xf32>
    %99 = tpu.concatenate %97, %98 in 1 : vector<8x8xf32>, vector<8x8xf32> -> vector<8x16xf32>
    %100 = arith.mulf %94, %17 : vector<8x16xf32>
    %101 = arith.mulf %99, %18 : vector<8x16xf32>
    %102 = arith.addf %100, %101 : vector<8x16xf32>
    %cst_32 = arith.constant 2.500000e-01 : f32
    %103 = vector.broadcast %cst_32 : f32 to vector<8x16xf32>
    %104 = arith.mulf %102, %103 : vector<8x16xf32>
    %cst_33 = arith.constant dense<0.000000e+00> : vector<8x8xf32>
    %105 = tpu.matmul %104, %37, %cst_33 {dimension_numbers = #tpu.dot_dimension_numbers<[1], [1], [0], [0], [0, 0, 1, 0], [], []>} : vector<8x16xf32>, vector<8x16xf32>, vector<8x8xf32> -> vector<8x8xf32>
    %cst_34 = arith.constant -1.000000e+30 : f32
    %106 = vector.broadcast %cst_34 : f32 to vector<8x8xf32>
    %107 = arith.select %41, %105, %106 : vector<8x8xi1>, vector<8x8xf32>
    %cst_35 = arith.constant dense<0xFF800000> : vector<8xf32>
    %108 = vector.multi_reduction <maximumf>, %107, %cst_35 [1] : vector<8x8xf32> to vector<8xf32>
    %109 = vector.shape_cast %108 : vector<8xf32> to vector<8x1xf32>
    %110 = vector.broadcast %109 : vector<8x1xf32> to vector<8x8xf32>
    %111 = arith.subf %107, %110 : vector<8x8xf32>
    %112 = math.exp %111 : vector<8x8xf32>
    %cst_36 = arith.constant dense<0.000000e+00> : vector<8xf32>
    %113 = vector.multi_reduction <add>, %112, %cst_36 [1] : vector<8x8xf32> to vector<8xf32>
    %114 = vector.shape_cast %113 : vector<8xf32> to vector<8x1xf32>
    %cst_37 = arith.constant 1.000000e+00 : f32
    %115 = vector.broadcast %cst_37 : f32 to vector<8x1xf32>
    %116 = arith.divf %115, %114 : vector<8x1xf32>
    %117 = vector.broadcast %116 : vector<8x1xf32> to vector<8x8xf32>
    %118 = arith.mulf %112, %117 : vector<8x8xf32>
    %cst_38 = arith.constant dense<0.000000e+00> : vector<8x16xf32>
    %119 = tpu.matmul %118, %38, %cst_38 {dimension_numbers = #tpu.dot_dimension_numbers<[1], [0], [0], [1], [0, 0, 1, 1], [], []>} : vector<8x8xf32>, vector<8x16xf32>, vector<8x16xf32> -> vector<8x16xf32>
    %120 = vector.extract_strided_slice %16 {offsets = [0, 48], sizes = [8, 16], strides = [1, 1]} : vector<8x128xf32> to vector<8x16xf32>
    %121 = vector.extract_strided_slice %120 {offsets = [0, 8], sizes = [8, 8], strides = [1, 1]} : vector<8x16xf32> to vector<8x8xf32>
    %cst_39 = arith.constant 0.000000e+00 : f32
    %122 = vector.broadcast %cst_39 : f32 to vector<8x8xf32>
    %123 = arith.subf %122, %121 : vector<8x8xf32>
    %124 = vector.extract_strided_slice %120 {offsets = [0, 0], sizes = [8, 8], strides = [1, 1]} : vector<8x16xf32> to vector<8x8xf32>
    %125 = tpu.concatenate %123, %124 in 1 : vector<8x8xf32>, vector<8x8xf32> -> vector<8x16xf32>
    %126 = arith.mulf %120, %17 : vector<8x16xf32>
    %127 = arith.mulf %125, %18 : vector<8x16xf32>
    %128 = arith.addf %126, %127 : vector<8x16xf32>
    %cst_40 = arith.constant 2.500000e-01 : f32
    %129 = vector.broadcast %cst_40 : f32 to vector<8x16xf32>
    %130 = arith.mulf %128, %129 : vector<8x16xf32>
    %cst_41 = arith.constant dense<0.000000e+00> : vector<8x8xf32>
    %131 = tpu.matmul %130, %37, %cst_41 {dimension_numbers = #tpu.dot_dimension_numbers<[1], [1], [0], [0], [0, 0, 1, 0], [], []>} : vector<8x16xf32>, vector<8x16xf32>, vector<8x8xf32> -> vector<8x8xf32>
    %cst_42 = arith.constant -1.000000e+30 : f32
    %132 = vector.broadcast %cst_42 : f32 to vector<8x8xf32>
    %133 = arith.select %41, %131, %132 : vector<8x8xi1>, vector<8x8xf32>
    %cst_43 = arith.constant dense<0xFF800000> : vector<8xf32>
    %134 = vector.multi_reduction <maximumf>, %133, %cst_43 [1] : vector<8x8xf32> to vector<8xf32>
    %135 = vector.shape_cast %134 : vector<8xf32> to vector<8x1xf32>
    %136 = vector.broadcast %135 : vector<8x1xf32> to vector<8x8xf32>
    %137 = arith.subf %133, %136 : vector<8x8xf32>
    %138 = math.exp %137 : vector<8x8xf32>
    %cst_44 = arith.constant dense<0.000000e+00> : vector<8xf32>
    %139 = vector.multi_reduction <add>, %138, %cst_44 [1] : vector<8x8xf32> to vector<8xf32>
    %140 = vector.shape_cast %139 : vector<8xf32> to vector<8x1xf32>
    %cst_45 = arith.constant 1.000000e+00 : f32
    %141 = vector.broadcast %cst_45 : f32 to vector<8x1xf32>
    %142 = arith.divf %141, %140 : vector<8x1xf32>
    %143 = vector.broadcast %142 : vector<8x1xf32> to vector<8x8xf32>
    %144 = arith.mulf %138, %143 : vector<8x8xf32>
    %cst_46 = arith.constant dense<0.000000e+00> : vector<8x16xf32>
    %145 = tpu.matmul %144, %38, %cst_46 {dimension_numbers = #tpu.dot_dimension_numbers<[1], [0], [0], [1], [0, 0, 1, 1], [], []>} : vector<8x8xf32>, vector<8x16xf32>, vector<8x16xf32> -> vector<8x16xf32>
    %146 = tpu.concatenate %67, %93, %119, %145 in 1 : vector<8x16xf32>, vector<8x16xf32>, vector<8x16xf32>, vector<8x16xf32> -> vector<8x64xf32>
    %c0_47 = arith.constant 0 : index
    %c0_48 = arith.constant 0 : index
    %147 = vector.load %arg5[%c0_47, %c0_48] : memref<64x64xf32, #tpu.memory_space<vmem>>, vector<64x64xf32>
    %cst_49 = arith.constant dense<0.000000e+00> : vector<8x64xf32>
    %148 = tpu.matmul %146, %147, %cst_49 {dimension_numbers = #tpu.dot_dimension_numbers<[1], [0], [0], [1], [0, 0, 1, 1], [], []>} : vector<8x64xf32>, vector<64x64xf32>, vector<8x64xf32> -> vector<8x64xf32>
    %149 = arith.addf %1, %148 : vector<8x64xf32>
    %150 = arith.mulf %149, %149 : vector<8x64xf32>
    %cst_50 = arith.constant dense<0.000000e+00> : vector<8xf32>
    %151 = vector.multi_reduction <add>, %150, %cst_50 [1] : vector<8x64xf32> to vector<8xf32>
    %152 = vector.shape_cast %151 : vector<8xf32> to vector<8x1xf32>
    %cst_51 = arith.constant 6.400000e+01 : f32
    %153 = vector.broadcast %cst_51 : f32 to vector<8x1xf32>
    %154 = arith.divf %152, %153 : vector<8x1xf32>
    %cst_52 = arith.constant 9.99999997E-7 : f32
    %155 = vector.broadcast %cst_52 : f32 to vector<8x1xf32>
    %156 = arith.addf %154, %155 : vector<8x1xf32>
    %157 = math.rsqrt %156 : vector<8x1xf32>
    %158 = vector.broadcast %157 : vector<8x1xf32> to vector<8x64xf32>
    %159 = arith.mulf %149, %158 : vector<8x64xf32>
    %c0_53 = arith.constant 0 : index
    %c0_54 = arith.constant 0 : index
    %160 = vector.load %arg3[%c0_53, %c0_54] : memref<1x64xf32, #tpu.memory_space<vmem>>, vector<1x64xf32>
    %161 = vector.broadcast %160 : vector<1x64xf32> to vector<8x64xf32>
    %162 = arith.mulf %159, %161 : vector<8x64xf32>
    %c0_55 = arith.constant 0 : index
    %c0_56 = arith.constant 0 : index
    %163 = vector.load %arg6[%c0_55, %c0_56] : memref<64x256xf32, #tpu.memory_space<vmem>>, vector<64x256xf32>
    %cst_57 = arith.constant dense<0.000000e+00> : vector<8x256xf32>
    %164 = tpu.matmul %162, %163, %cst_57 {dimension_numbers = #tpu.dot_dimension_numbers<[1], [0], [0], [1], [0, 0, 1, 1], [], []>} : vector<8x64xf32>, vector<64x256xf32>, vector<8x256xf32> -> vector<8x256xf32>
    %165 = vector.extract_strided_slice %164 {offsets = [0, 0], sizes = [8, 128], strides = [1, 1]} : vector<8x256xf32> to vector<8x128xf32>
    %166 = vector.extract_strided_slice %164 {offsets = [0, 128], sizes = [8, 128], strides = [1, 1]} : vector<8x256xf32> to vector<8x128xf32>
    %167 = arith.negf %165 : vector<8x128xf32>
    %168 = math.exp %167 : vector<8x128xf32>
    %cst_58 = arith.constant 1.000000e+00 : f32
    %169 = vector.broadcast %cst_58 : f32 to vector<8x128xf32>
    %170 = arith.addf %169, %168 : vector<8x128xf32>
    %171 = arith.divf %169, %170 : vector<8x128xf32>
    %172 = arith.mulf %165, %171 : vector<8x128xf32>
    %173 = arith.mulf %172, %166 : vector<8x128xf32>
    %c0_59 = arith.constant 0 : index
    %c0_60 = arith.constant 0 : index
    %174 = vector.load %arg7[%c0_59, %c0_60] : memref<128x64xf32, #tpu.memory_space<vmem>>, vector<128x64xf32>
    %cst_61 = arith.constant dense<0.000000e+00> : vector<8x64xf32>
    %175 = tpu.matmul %173, %174, %cst_61 {dimension_numbers = #tpu.dot_dimension_numbers<[1], [0], [0], [1], [0, 0, 1, 1], [], []>} : vector<8x128xf32>, vector<128x64xf32>, vector<8x64xf32> -> vector<8x64xf32>
    %176 = arith.addf %149, %175 : vector<8x64xf32>
    %c0_62 = arith.constant 0 : index
    %c0_63 = arith.constant 0 : index
    %c0_64 = arith.constant 0 : index
    %177 = vector.load %arg10[%c0_62, %c0_63, %c0_64] : memref<1x8x64xf32, #tpu.memory_space<vmem>>, vector<1x8x64xf32>
    %178 = vector.shape_cast %177 : vector<1x8x64xf32> to vector<8x64xf32>
    %179 = vector.shape_cast %176 : vector<8x64xf32> to vector<1x8x64xf32>
    tpu.vector_store %arg10[%c0_62, %c0_63, %c0_64], %179 {strides = array<i32>} : memref<1x8x64xf32, #tpu.memory_space<vmem>>, vector<1x8x64xf32>,
    return
  }
  func.func @transform_0(%arg0: i32) -> (i32, i32, i32) {
    %c0_i32 = arith.constant 0 : i32
    %c0_i32_0 = arith.constant 0 : i32
    %c0_i32_1 = arith.constant 0 : i32
    return %arg0, %c0_i32, %c0_i32_0 : i32, i32, i32
  }
  func.func @transform_1(%arg0: i32) -> (i32, i32) {
    %c0_i32 = arith.constant 0 : i32
    %c0_i32_0 = arith.constant 0 : i32
    %c0_i32_1 = arith.constant 0 : i32
    return %c0_i32, %c0_i32_0 : i32, i32
  }
  func.func @transform_2(%arg0: i32) -> (i32, i32) {
    %c0_i32 = arith.constant 0 : i32
    %c0_i32_0 = arith.constant 0 : i32
    %c0_i32_1 = arith.constant 0 : i32
    return %c0_i32, %c0_i32_0 : i32, i32
  }
  func.func @transform_3(%arg0: i32) -> (i32, i32) {
    %c0_i32 = arith.constant 0 : i32
    %c0_i32_0 = arith.constant 0 : i32
    %c0_i32_1 = arith.constant 0 : i32
    return %c0_i32, %c0_i32_0 : i32, i32
  }
  func.func @transform_4(%arg0: i32) -> (i32, i32) {
    %c0_i32 = arith.constant 0 : i32
    %c0_i32_0 = arith.constant 0 : i32
    %c0_i32_1 = arith.constant 0 : i32
    return %c0_i32, %c0_i32_0 : i32, i32
  }
  func.func @transform_5(%arg0: i32) -> (i32, i32) {
    %c0_i32 = arith.constant 0 : i32
    %c0_i32_0 = arith.constant 0 : i32
    %c0_i32_1 = arith.constant 0 : i32
    return %c0_i32, %c0_i32_0 : i32, i32
  }
  func.func @transform_6(%arg0: i32) -> (i32, i32) {
    %c0_i32 = arith.constant 0 : i32
    %c0_i32_0 = arith.constant 0 : i32
    %c0_i32_1 = arith.constant 0 : i32
    return %c0_i32, %c0_i32_0 : i32, i32
  }
  func.func @transform_7(%arg0: i32) -> (i32, i32) {
    %c0_i32 = arith.constant 0 : i32
    %c0_i32_0 = arith.constant 0 : i32
    %c0_i32_1 = arith.constant 0 : i32
    return %c0_i32, %c0_i32_0 : i32, i32
  }
  func.func @transform_8(%arg0: i32) -> (i32, i32) {
    %c0_i32 = arith.constant 0 : i32
    %c0_i32_0 = arith.constant 0 : i32
    %c0_i32_1 = arith.constant 0 : i32
    return %c0_i32, %c0_i32_0 : i32, i32
  }
  func.func @transform_9(%arg0: i32) -> (i32, i32, i32) {
    %c0_i32 = arith.constant 0 : i32
    %c0_i32_0 = arith.constant 0 : i32
    %c0_i32_1 = arith.constant 0 : i32
    return %arg0, %c0_i32, %c0_i32_0 : i32, i32, i32
  }
}

</mosaic_0001>

<bundles_post_ra>
// kernel: decoder_layer.1
= control target key start
LH: loop header
LB: loop body
LE: loop exit
PB: predicated region body
PF: predicated region fallthrough
CT: control target
= control target key end

     0   :  { %14 = vsyncpa [#allocation3], 0  ;;  %s1672_s0 = inlined_call_operand.vmem [shape: f32[2,8,64], index: 0, kind: input, shape index: {}]   ;;  %s1673_s1 = inlined_call_operand.vmem [shape: f32[1,64], index: 1, kind: input, shape index: {}]   ;;  %s1674_s2 = inlined_call_operand.vmem [shape: f32[1,64], index: 2, kind: input, shape index: {}]   ;;  %s1675_s3 = inlined_call_operand.vmem [shape: f32[64,128], index: 3, kind: input, shape index: {}]   ;;  %s1676_s4 = inlined_call_operand.vmem [shape: f32[64,64], index: 4, kind: input, shape index: {}]   ;;  %s1677_s5 = inlined_call_operand.vmem [shape: f32[64,256], index: 5, kind: input, shape index: {}]   ;;  %s1678_s6 = inlined_call_operand.vmem [shape: f32[128,64], index: 6, kind: input, shape index: {}]   ;;  %s1679_s7 = inlined_call_operand.vmem [shape: f32[8,16], index: 7, kind: input, shape index: {}]   ;;  %s1680_s8 = inlined_call_operand.vmem [shape: f32[8,16], index: 8, kind: input, shape index: {}]   ;;  %s1681_s9 = inlined_call_operand.hbm [shape: f32[2,8,64], index: 9, kind: output, shape index: {}]  }
   0x1   :  { %16 = vsyncpa [#allocation3 + $0x1], 0  ;;  %s1314_s30 = smov 0   ;;  %s1316_s10 = smov 0  }
   0x2   :  { %s1318_s11 = smov 0   ;;  %s1320_s12 = smov 0  }
   0x3 LB: > { %s1335_s13 = sadd.s32 4294967295, %s1247_s12   ;;  %s1076_s14 = sadd.s32 4294967294, %s1247_s12   ;;  %s1247_s12 = sphi %s1320_s12, %s1687_s12   ;;  %s1243_s11 = sphi %s1318_s11, %s1686_s11   ;;  %s1239_s10 = sphi %s1316_s10, %s1685_s10   ;;  %s1235_s30 = sphi %s1314_s30, %s1684_s30  }
   0x4   : > { %s1339_s15 = sadd.s32 1, %s1247_s12   ;;  %s223_s16 = sadd.s32 1, %s1243_s11 }
   0x5   : > { %s220_s17 = ssub.s32 %s1247_s12, %s1339_s15  ;;  %p233_p0 = scmp.ne.s32.totalorder %s1243_s11, %s1239_s10 }
   0x6   : > { %p221_p1 = scmp.eq.s32.totalorder %s220_s17, 0  ;;  %p234_p2 = scmp.eq.s32.totalorder %s1335_s13, 1 }
   0x7   : > { %p239_p3 = scmp.ne.s32.totalorder %s1239_s10, %s1235_s30  ;;  %p240_p4 = scmp.eq.s32.totalorder %s1076_s14, 1 }
   0x8   : > { %s1350_s18 = scalar_select %p221_p1, %s1243_s11, %s223_s16  }
   0x9   : > { %p1352_p5 = por %p234_p2, %p233_p0  ;;  %p1356_p6 = por %p240_p4, %p239_p3 }
   0xa   : > { %p1079_p7 = scmp.ge.s32.totalorder %s1247_s12, 1  ;;  %p289_p8 = scmp.lt.s32.totalorder %s1247_s12, 3 }
   0xc   : > { %p290_p9 = pnand %p1079_p7, %p289_p8 }
   0xd   : > { %p324_p10 = scmp.lt.s32.totalorder (!%p290_p9), %s1335_s13, 1  ;;  %s1250_s17 = smov (!%p290_p9), 120  }
   0xe   : > { %293 = sbr.rel (%p290_p9) target bundleno = 2252 (0x8cc), region = 56  ;;  %s1254_s26 = smov (!%p290_p9), 104  }
   0xf   : > { %s1255_s27 = smov (!%p290_p9), 8   ;;  %s1256_s28 = smov (!%p290_p9), 16  }
  0x10   : > { %s1257_s16 = smov (!%p290_p9), 40   ;;  %s1259_s23 = smov (!%p290_p9), 88  }
  0x11   : > { %s1260_s24 = smov (!%p290_p9), 80  }
  0x13   : > { %s325_s21 = scalar_select %p324_p10, %s1335_s13, 1  ;;  %vm330_vm0 = vcmask 523264   ;;  %v1249_v3 = vmov 64.0   ;;  %v366_v5 = vld [vmem:[%s1675_s3 + $0x38] sm:$0xff]  ;;  %v365_v6 = vld [vmem:[%s1675_s3 + $0x30] sm:$0xff]  ;;  %v364_v8 = vld [vmem:[%s1675_s3 + $0x28] sm:$0xff] }
  0x14   : > { %1159 = vrcp.f32 %v1249_v3  ;;  %378 = vmatpush.msra.mxu0 %v366_v5  ;;  %v363_v9 = vld [vmem:[%s1675_s3 + $0x20] sm:$0xff]  ;;  %v362_v11 = vld [vmem:[%s1675_s3 + $0x18] sm:$0xff]  ;;  %v361_v12 = vld [vmem:[%s1675_s3 + $0x10] sm:$0xff]  ;;  %vm401_vm5 = vcmask 64512   ;;  %vm450_vm6 = vcmask 130048  }
  0x15   : > { %s1081_s22 = sshll.u32 %s325_s21, 3  ;;  %v360_v13 = vld [vmem:[%s1675_s3 + $0x8] sm:$0xff]  ;;  %v359_v15 = vld [vmem:[%s1675_s3] sm:$0xff]  ;;  %s1251_s21 = smov 72  }
  0x16   : > { %s327_s25 = scalar_lea.vmem %s1672_s0, %s1081_s22  ;;  %379 = vmatpush.msra.mxu0 %v365_v6  ;;  %v1157_v27 = vld [vmem:[%s1673_s1] ss:$0 sm:$0xff]  ;;  %s1252_s22 = smov 56  }
  0x17   : > { %v1367_v0 = vld [vmem:[%s327_s25] sm:$0xff]  ;;  %s1253_s25 = smov 64  }
  0x18   : > { %v329_v1 = vmul.f32 %v1367_v0, %v1367_v0  ;;  %380 = vmatpush.msra.mxu0 %v364_v8  ;;  %v390_v33 = vld [vmem:[%s1679_s7] sm:$0xff] }
  0x19   : > { %v1420_v35 = vld [vmem:[%s1680_s8] sm:$0xff] }
  0x1a   : > { %v331_v2 = vsel %vm330_vm0, %v329_v1, 0.0  ;;  %v1160_v4 = vpop.eup %1159  ;;  %381 = vmatpush.msra.mxu0 %v363_v9  ;;  %v431_v9 = vlaneseq }
  0x1b   : > { %332 = vadd.xlane.f32.xlu0 %v331_v2  ;;  %v335_v7 = vmul.f32 64.0, %v1160_v4  ;;  %vm339_vm1 = vweird.f32 %v1160_v4 }
  0x1c   : > { %382 = vmatpush.msra.mxu0 %v362_v11  ;;  %v1454_v11 = vand.u32 127, %v431_v9 }
  0x1d   : > { %v336_v10 = vsub.f32 1.0, %v335_v7 }
  0x1e   : > { %383 = vmatpush.msra.mxu0 %v361_v12 }
  0x1f   : > { %v337_v14 = vmul.f32 %v1160_v4, %v336_v10  ;;  %v1452_v10 = vshrl.u32 %v431_v9, 7 }
  0x20   : > { %384 = vmatpush.msra.mxu0 %v360_v13 }
  0x21   : > { %v338_v16 = vadd.f32 %v1160_v4, %v337_v14  ;;  %vm435_vm7 = vcmp.le.s32.totalorder %v1454_v11, %v1452_v10 }
  0x22   : > { %385 = vmatpush.msra.mxu0 %v359_v15 }
  0x23   : > { %v1396_v17 = vsel %vm339_vm1, %v1160_v4, %v338_v16 }
  0x8e   : > { %v333_v18 = vpop.xlane.xlu0 %332 }
  0x8f   : > { %v341_v19 = vmul.f32 %v1396_v17, %v333_v18 }
  0x91   : > { %v342_v20 = vadd.f32 1e-06, %v341_v19 }
  0x93   : > { %1161 = vrsqrt.f32 %v342_v20  ;;  %vm349_vm3 = vweird.f32 %v342_v20 }
  0x99   : > { %v1162_v21 = vpop.eup %1161 }
  0x9a   : > { %v344_v22 = vmul.f32 %v1162_v21, %v342_v20  ;;  %vm350_vm2 = vweird.f32 %v1162_v21 }
  0x9b   : > { %vm351_vm4 = vmor %vm349_vm3, %vm350_vm2 }
  0x9c   : > { %v345_v23 = vmul.f32 %v1162_v21, %v344_v22 }
  0x9e   : > { %v346_v24 = vmul.f32 0.5, %v345_v23 }
  0xa0   : > { %v347_v25 = vsub.f32 1.5, %v346_v24 }
  0xa2   : > { %v348_v26 = vmul.f32 %v1162_v21, %v347_v25 }
  0xa4   : > { %v352_v28 = vsel %vm351_vm4, %v1162_v21, %v348_v26 }
  0xa5   : > { %v353_v29 = vmul.f32 %v352_v28, %v1367_v0 }
  0xa7   : > { %v358_v30 = vmul.f32 %v1157_v27, %v353_v29 }
  0xa9   : > { %1082 = vmatmul.msk.f32.vlgmr.msra.gmra.mxu0 %vm330_vm0, %v358_v30 }
 0x126   : > { %v1404_v31 = vpop.f32.mrf.mxu0 }
 0x127   : > { %531 = vrot.lane.b32.xlu2 %v1404_v31, %s1250_s17  ;;  %398 = vrot.lane.b32.xlu1 %v1404_v31, %s1251_s21  ;;  %v392_v32 = vsub.f32 0.0, %v1404_v31  ;;  %v443_v57 = vmul.f32 %v390_v33, %v1404_v31 }
 0x129   : > { %394 = vrot.lane.b32.xlu0 %v392_v32, %s1252_s22 }
 0x12f   : > { %404 = vrot.lane.b32.xlu2 %v390_v33, %s1253_s25  ;;  %528 = vrot.lane.b32.xlu1 %v392_v32, %s1254_s26 }
 0x131   : > { %439 = vrot.lane.b32.xlu0 %v1404_v31, %s1255_s27  ;;  %s1262_s27 = smov 48  }
 0x137   : > { %535 = vrot.lane.b32.xlu2 %v390_v33, %s1256_s28 }
 0x13f   : > { %436 = vrot.lane.b32.xlu2 %v392_v32, %s1250_s17  ;;  %s1258_s17 = smov 112  }
 0x181   : > { %v532_v39 = vpop.permute.xlu2 %531 }
 0x189   : > { %v405_v43 = vpop.permute.xlu2 %404 }
 0x18a   : > { %v407_v44 = vmul.f32 %v405_v43, %v1404_v31 }
 0x191   : > { %v536_v47 = vpop.permute.xlu2 %535 }
 0x192   : > { %v538_v48 = vmul.f32 %v536_v47, %v1404_v31 }
 0x199   : > { %v399_v34 = vpop.permute.xlu1 %398  ;;  %v437_v52 = vpop.permute.xlu2 %436 }
 0x19b   : > { %v395_v36 = vpop.permute.xlu0 %394 }
 0x19c   : > { %v402_v37 = vsel %vm401_vm5, %v395_v36, %v399_v34 }
 0x19d   : > { %v408_v38 = vmul.f32 %v402_v37, %v1420_v35 }
 0x19f   : > { %410 = vrot.lane.b32.xlu1 %v408_v38, %s1253_s25 }
 0x1a1   : > { %v529_v40 = vpop.permute.xlu1 %528 }
 0x1a2   : > { %v534_v41 = vsel %vm401_vm5, %v529_v40, %v532_v39 }
 0x1a3   : > { %v539_v42 = vmul.f32 %v534_v41, %v1420_v35  ;;  %v440_v53 = vpop.permute.xlu0 %439 }
 0x1a4   : > { %v442_v54 = vsel %vm401_vm5, %v437_v52, %v440_v53 }
 0x1a5   : > { %v444_v55 = vmul.f32 %v442_v54, %v1420_v35 }
 0x1a7   : > { %541 = vrot.lane.b32.xlu1 %v539_v42, %s1256_s28  ;;  %v445_v58 = vadd.f32 %v444_v55, %v443_v57 }
 0x1a9   : > { %v446_v60 = vmul.f32 0.25, %v445_v58 }
 0x211   : > { %v411_v45 = vpop.permute.xlu1 %410 }
 0x212   : > { %v413_v46 = vadd.f32 %v411_v45, %v407_v44 }
 0x214   : > { %448 = vrot.lane.b32.xlu1 %v413_v46, %s1253_s25  ;;  %s1261_s25 = smov 32  }
 0x219   : > { %v542_v49 = vpop.permute.xlu1 %541 }
 0x21a   : > { %v544_v50 = vadd.f32 %v542_v49, %v538_v48 }
 0x21c   : > { %v545_v51 = vmul.f32 0.25, %v544_v50  ;;  %414 = vrot.lane.b32.xlu1 %v392_v32, %s1257_s16 }
 0x21e   : > { %547 = vrot.lane.b32.xlu2 %v545_v51, %s1258_s17 }
 0x224   : > { %620 = vrot.lane.b32.xlu1 %v392_v32, %s1259_s23 }
 0x226   : > { %417 = vrot.lane.b32.xlu2 %v1404_v31, %s1252_s22  ;;  %s321_s22 = sand.u32 1, %s1239_s10  }
 0x22c   : > { %720 = vrot.lane.b32.xlu1 %v392_v32, %s1251_s21  ;;  %s1263_s21 = smov 96  }
 0x22e   : > { %623 = vrot.lane.b32.xlu2 %v1404_v31, %s1254_s26  ;;  %s1080_s26 = sshll.u32 %s321_s22, 3 }
 0x236   : > { %723 = vrot.lane.b32.xlu2 %v1404_v31, %s1259_s23  ;;  %s1002_s23 = scalar_lea.sflag [#allocation3], %s321_s22 }
 0x23e   : > { %421 = vrot.lane.b32.xlu2 %v390_v33, %s1260_s24 }
 0x246   : > { %627 = vrot.lane.b32.xlu2 %v390_v33, %s1261_s25 }
 0x24e   : > { %727 = vrot.lane.b32.xlu2 %v390_v33, %s1262_s27 }
 0x278   : > { %v548_v56 = vpop.permute.xlu2 %547 }
 0x280   : > { %v418_v61 = vpop.permute.xlu2 %417 }
 0x286   : > { %v449_v59 = vpop.permute.xlu1 %448 }
 0x287   : > { %1083 = vmatpush.xpose.msk.msra.mxu3 %vm450_vm6, %v449_v59 }
 0x288   : > { %v624_v1 = vpop.permute.xlu2 %623 }
 0x28a   : > { %1084 = vmatmul.msk.f32.vlgmr.msra.gmra.mxu3 %vm450_vm6, %v446_v60 }
 0x28b   : > { %1086 = vmatpush.xpose.msk.msrb.mxu3 %vm450_vm6, %v449_v59 }
 0x28e   : > { %v415_v62 = vpop.permute.xlu1 %414 }
 0x28f   : > { %v420_v63 = vsel %vm401_vm5, %v415_v62, %v418_v61 }
 0x290   : > { %v724_v5 = vpop.permute.xlu2 %723  ;;  %v425_v19 = vmul.f32 %v420_v63, %v1420_v35 }
 0x292   : > { %1087 = vmatmul.msk.f32.vlgmr.msrb.gmra.mxu3 %vm450_vm6, %v548_v56 }
 0x296   : > { %v621_v2 = vpop.permute.xlu1 %620 }
 0x297   : > { %v626_v3 = vsel %vm401_vm5, %v621_v2, %v624_v1 }
 0x298   : > { %v631_v4 = vmul.f32 %v626_v3, %v1420_v35  ;;  %v422_v20 = vpop.permute.xlu2 %421 }
 0x299   : > { %v424_v33 = vmul.f32 %v422_v20, %v1404_v31 }
 0x29a   : > { %633 = vrot.lane.b32.xlu2 %v631_v4, %s1261_s25 }
 0x29e   : > { %v721_v6 = vpop.permute.xlu1 %720 }
 0x29f   : > { %v726_v7 = vsel %vm401_vm5, %v721_v6, %v724_v5 }
 0x2a0   : > { %v731_v8 = vmul.f32 %v726_v7, %v1420_v35  ;;  %v628_v21 = vpop.permute.xlu2 %627 }
 0x2a1   : > { %v630_v38 = vmul.f32 %v628_v21, %v1404_v31 }
 0x2a2   : > { %733 = vrot.lane.b32.xlu2 %v731_v8, %s1262_s27 }
 0x2a8   : > { %v728_v25 = vpop.permute.xlu2 %727 }
 0x2a9   : > { %v730_v41 = vmul.f32 %v728_v25, %v1404_v31 }
 0x2f4   : > { %v634_v32 = vpop.permute.xlu2 %633 }
 0x2f5   : > { %v636_v39 = vadd.f32 %v634_v32, %v630_v38 }
 0x2f7   : > { %v637_v43 = vmul.f32 0.25, %v636_v39 }
 0x2fc   : > { %v734_v40 = vpop.permute.xlu2 %733 }
 0x2fd   : > { %v736_v42 = vadd.f32 %v734_v40, %v730_v41 }
 0x2ff   : > { %v737_v44 = vmul.f32 0.25, %v736_v42 }
 0x30d   : > { %v473_v12 = vpop.f32.mrf.mxu3 }
 0x30e   : > { %v476_v13 = vsel %vm435_vm7, %v473_v12, -1e+30 }
 0x30f   : > { %v477_v14 = vsel %vm401_vm5, %v476_v13, -inf }
 0x310   : > { %478 = vmax.xlane.f32.xlu0 %v477_v14 }
 0x315   : > { %v568_v15 = vpop.f32.mrf.mxu3 }
 0x316   : > { %v571_v16 = vsel %vm435_vm7, %v568_v15, -1e+30 }
 0x317   : > { %v572_v18 = vsel %vm401_vm5, %v571_v16, -inf }
 0x318   : > { %573 = vmax.xlane.f32.xlu1 %v572_v18 }
 0x324   : > { %427 = vrot.lane.b32.xlu0 %v425_v19, %s1260_s24 }
 0x331   : > { %502 = vrot.lane.b32.xlu1 %v1404_v31, %s1261_s25 }
 0x383   : > { %v479_v22 = vpop.xlane.xlu0 %478 }
 0x384   : > { %v480_v23 = vsub.f32 %v476_v13, %v479_v22 }
 0x386   : > { %v481_v24 = vmul.f32 1.442695, %v480_v23 }
 0x388   : > { %1163 = vpow2.f32 %v481_v24 }
 0x38b   : > { %v574_v26 = vpop.xlane.xlu1 %573 }
 0x38c   : > { %v575_v27 = vsub.f32 %v571_v16, %v574_v26 }
 0x38e   : > { %v1164_v28 = vpop.eup %1163  ;;  %v576_v29 = vmul.f32 1.442695, %v575_v27 }
 0x38f   : > { %v483_v30 = vsel %vm401_vm5, %v1164_v28, 0.0 }
 0x390   : > { %1165 = vpow2.f32 %v576_v29  ;;  %484 = vadd.xlane.f32.xlu0 %v483_v30 }
 0x396   : > { %v1166_v34 = vpop.eup %1165  ;;  %v428_v35 = vpop.permute.xlu0 %427 }
 0x397   : > { %v430_v36 = vadd.f32 %v428_v35, %v424_v33  ;;  %v578_v37 = vsel %vm401_vm5, %v1166_v34, 0.0 }
 0x398   : > { %579 = vadd.xlane.f32.xlu2 %v578_v37 }
 0x399   : > { %642 = vrot.lane.b32.xlu1 %v430_v36, %s1262_s27 }
 0x3a1   : > { %639 = vrot.lane.b32.xlu1 %v637_v43, %s1263_s21 }
 0x3a3   : > { %v503_v45 = vpop.permute.xlu1 %502 }
 0x3a4   : > { %523 = vmatpush.msra.mxu2 %v503_v45  ;;  %739 = vrot.lane.b32.xlu0 %v737_v44, %s1260_s24 }
 0x3a6   : > { %615 = vmatpush.msrb.mxu2 %v503_v45 }
 0x403   : > { %v485_v46 = vpop.xlane.xlu0 %484 }
 0x404   : > { %1167 = vrcp.f32 %v485_v46  ;;  %v497_v52 = vand.u32 2147483648, %v485_v46  ;;  %v495_v54 = vand.u32 2147483647, %v485_v46  ;;  %vm491_vm9 = vweird.f32 %v485_v46 }
 0x406   : > { %v498_v57 = vor.u32 1.1754944e-38, %v497_v52  ;;  %vm496_vm11 = vcmp.eq.f32.partialorder %v495_v54, 8.507059e+37  ;;  %v836_v54 = vld [vmem:[%s1676_s4 + $0x38] sm:$0xff] }
 0x40a   : > { %v1168_v47 = vpop.eup %1167 }
 0x40b   : > { %v487_v48 = vmul.f32 %v1168_v47, %v485_v46  ;;  %v580_v49 = vpop.xlane.xlu2 %579  ;;  %v643_v50 = vpop.permute.xlu1 %642  ;;  %vm492_vm8 = vweird.f32 %v1168_v47 }
 0x40c   : > { %1169 = vrcp.f32 %v580_v49  ;;  %1089 = vmatpush.xpose.msk.msrb.mxu0 %vm450_vm6, %v643_v50  ;;  %vm493_vm10 = vmor %vm491_vm9, %vm492_vm8  ;;  %v592_v1 = vand.u32 2147483648, %v580_v49  ;;  %v590_v3 = vand.u32 2147483647, %v580_v49  ;;  %vm586_vm13 = vweird.f32 %v580_v49 }
 0x40d   : > { %v488_v51 = vsub.f32 1.0, %v487_v48 }
 0x40e   : > { %v593_v5 = vor.u32 1.1754944e-38, %v592_v1  ;;  %vm591_vm15 = vcmp.eq.f32.partialorder %v590_v3, 8.507059e+37 }
 0x40f   : > { %v489_v53 = vmul.f32 %v1168_v47, %v488_v51 }
 0x411   : > { %v490_v55 = vadd.f32 %v1168_v47, %v489_v53 }
 0x412   : > { %v1170_v56 = vpop.eup %1169 }
 0x413   : > { %v582_v58 = vmul.f32 %v1170_v56, %v580_v49  ;;  %v640_v59 = vpop.permute.xlu1 %639  ;;  %v494_v60 = vsel %vm493_vm10, %v1168_v47, %v490_v55  ;;  %vm587_vm12 = vweird.f32 %v1170_v56  ;;  %v835_v55 = vld [vmem:[%s1676_s4 + $0x30] sm:$0xff] }
 0x414   : > { %1090 = vmatmul.msk.f32.vlgmr.msrb.gmra.mxu0 %vm450_vm6, %v640_v59  ;;  %v499_v61 = vsel %vm496_vm11, %v498_v57, %v494_v60  ;;  %vm588_vm14 = vmor %vm586_vm13, %vm587_vm12  ;;  %v833_v57 = vld [vmem:[%s1676_s4 + $0x20] sm:$0xff]  ;;  %v832_v60 = vld [vmem:[%s1676_s4 + $0x18] sm:$0xff]  ;;  %vm827_vm11 = vcmask 392192  }
 0x415   : > { %v583_v62 = vsub.f32 1.0, %v582_v58  ;;  %v501_v63 = vmul.f32 %v1164_v28, %v499_v61  ;;  %v831_v61 = vld [vmem:[%s1676_s4 + $0x10] sm:$0xff] }
 0x416   : > { %v740_v9 = vpop.permute.xlu0 %739 }
 0x417   : > { %v584_v2 = vmul.f32 %v1170_v56, %v583_v62  ;;  %1085 = vmatmul.msk.f32.vlgmr.msra.gmra.mxu2 %vm401_vm5, %v501_v63  ;;  %v830_v62 = vld [vmem:[%s1676_s4 + $0x8] sm:$0xff]  ;;  %v829_v63 = vld [vmem:[%s1676_s4] sm:$0xff] }
 0x418   : > { %1092 = vmatpush.xpose.msk.msra.mxu2 %vm450_vm6, %v643_v50 }
 0x419   : > { %v585_v4 = vadd.f32 %v1170_v56, %v584_v2 }
 0x41b   : > { %v589_v6 = vsel %vm588_vm14, %v1170_v56, %v585_v4  ;;  %v834_v56 = vld [vmem:[%s1676_s4 + $0x28] sm:$0xff] }
 0x41c   : > { %v594_v7 = vsel %vm591_vm15, %v593_v5, %v589_v6 }
 0x41d   : > { %v596_v8 = vmul.f32 %v1166_v34, %v594_v7 }
 0x41f   : > { %1088 = vmatmul.msk.f32.vlgmr.msrb.gmra.mxu2 %vm401_vm5, %v596_v8 }
 0x427   : > { %1093 = vmatmul.msk.f32.vlgmr.msra.gmra.mxu2 %vm450_vm6, %v740_v9 }
 0x491   : > { %v665_v12 = vpop.f32.mrf.mxu0 }
 0x492   : > { %v668_v13 = vsel %vm435_vm7, %v665_v12, -1e+30 }
 0x493   : > { %v669_v14 = vsel %vm401_vm5, %v668_v13, -inf }
 0x494   : > { %670 = vmax.xlane.f32.xlu2 %v669_v14  ;;  %v898_v14 = vld [vmem:[%s1677_s5 + $0x78] sm:$0xff] }
 0x495   : > { %930 = vmatpush.msrb.mxu2 %v898_v14 }
 0x49a   : > { %v1487_v15 = vpop.f32.mrf.mxu2 }
 0x4a2   : > { %v617_v16 = vpop.f32.mrf.mxu2 }
 0x4aa   : > { %v760_v18 = vpop.f32.mrf.mxu2 }
 0x4ab   : > { %v763_v19 = vsel %vm435_vm7, %v760_v18, -1e+30  ;;  %v894_v18 = vld [vmem:[%s1677_s5 + $0x58] sm:$0xff] }
 0x4ac   : > { %v764_v20 = vsel %vm401_vm5, %v763_v19, -inf }
 0x4ad   : > { %765 = vmax.xlane.f32.xlu1 %v764_v20  ;;  %v892_v20 = vld [vmem:[%s1677_s5 + $0x48] sm:$0xff] }
 0x507   : > { %v671_v21 = vpop.xlane.xlu2 %670 }
 0x508   : > { %v672_v22 = vsub.f32 %v668_v13, %v671_v21  ;;  %v897_v13 = vld [vmem:[%s1677_s5 + $0x70] sm:$0xff] }
 0x509   : > { %910 = vmatpush.msra.mxu0 %v897_v13  ;;  %v889_v21 = vld [vmem:[%s1677_s5 + $0x30] sm:$0xff] }
 0x50a   : > { %v673_v23 = vmul.f32 1.442695, %v672_v22  ;;  %v890_v22 = vld [vmem:[%s1677_s5 + $0x38] sm:$0xff] }
 0x50c   : > { %1171 = vpow2.f32 %v673_v23  ;;  %v887_v23 = vld [vmem:[%s1677_s5 + $0x20] sm:$0xff] }
 0x512   : > { %v1172_v24 = vpop.eup %1171 }
 0x513   : > { %v675_v25 = vsel %vm401_vm5, %v1172_v24, 0.0 }
 0x514   : > { %676 = vadd.xlane.f32.xlu2 %v675_v25  ;;  %v885_v25 = vld [vmem:[%s1677_s5 + $0x10] sm:$0xff] }
 0x520   : > { %v766_v26 = vpop.xlane.xlu1 %765 }
 0x521   : > { %v767_v27 = vsub.f32 %v763_v19, %v766_v26  ;;  %v891_v19 = vld [vmem:[%s1677_s5 + $0x40] sm:$0xff]  ;;  %v886_v26 = vld [vmem:[%s1677_s5 + $0x18] sm:$0xff] }
 0x523   : > { %v768_v28 = vmul.f32 1.442695, %v767_v27  ;;  %v883_v27 = vld [vmem:[%s1677_s5] sm:$0xff] }
 0x525   : > { %1173 = vpow2.f32 %v768_v28  ;;  %v884_v28 = vld [vmem:[%s1677_s5 + $0x8] sm:$0xff] }
 0x52b   : > { %v1174_v29 = vpop.eup %1173 }
 0x52c   : > { %694 = vrot.lane.b32.xlu2 %v1404_v31, %s1256_s28  ;;  %v770_v10 = vsel %vm401_vm5, %v1174_v29, 0.0 }
 0x52d   : > { %771 = vadd.xlane.f32.xlu0 %v770_v10 }
 0x534   : > { %813 = vrot.lane.b32.xlu2 %v617_v16, %s1256_s28  ;;  %v893_v16 = vld [vmem:[%s1677_s5 + $0x50] sm:$0xff]  ;;  %s1100_s28 = sshll.u32 %s1335_s13, 3 }
 0x587   : > { %v677_v11 = vpop.xlane.xlu2 %676 }
 0x588   : > { %1175 = vrcp.f32 %v677_v11  ;;  %v689_v35 = vand.u32 2147483648, %v677_v11  ;;  %v687_v37 = vand.u32 2147483647, %v677_v11  ;;  %vm683_vm2 = vweird.f32 %v677_v11 }
 0x58a   : > { %v690_v31 = vor.u32 1.1754944e-38, %v689_v35  ;;  %vm688_vm4 = vcmp.eq.f32.partialorder %v687_v37, 8.507059e+37  ;;  %v1158_v37 = vld [vmem:[%s1674_s2] ss:$0 sm:$0xff] }
 0x58e   : > { %v1176_v30 = vpop.eup %1175 }
 0x58f   : > { %v679_v32 = vmul.f32 %v1176_v30, %v677_v11  ;;  %v695_v33 = vpop.permute.xlu2 %694  ;;  %vm684_vm1 = vweird.f32 %v1176_v30 }
 0x590   : > { %715 = vmatpush.msra.mxu3 %v695_v33  ;;  %807 = vmatpush.msra.mxu1 %v695_v33  ;;  %vm685_vm3 = vmor %vm683_vm2, %vm684_vm1 }
 0x591   : > { %v680_v34 = vsub.f32 1.0, %v679_v32 }
 0x592   : > { %848 = vmatpush.msrb.mxu3 %v836_v54  ;;  %v963_v54 = vld [vmem:[%s1678_s6] sm:$0xff] }
 0x593   : > { %v681_v36 = vmul.f32 %v1176_v30, %v680_v34 }
 0x594   : > { %849 = vmatpush.msrb.mxu3 %v835_v55 }
 0x595   : > { %v682_v38 = vadd.f32 %v1176_v30, %v681_v36 }
 0x596   : > { %850 = vmatpush.msrb.mxu3 %v834_v56 }
 0x597   : > { %v686_v39 = vsel %vm685_vm3, %v1176_v30, %v682_v38  ;;  %v814_v1 = vpop.permute.xlu2 %813 }
 0x598   : > { %v691_v40 = vsel %vm688_vm4, %v690_v31, %v686_v39  ;;  %851 = vmatpush.msrb.mxu3 %v833_v57  ;;  %v824_v2 = vsel %vm450_vm6, %v1487_v15, %v814_v1  ;;  %v896_v15 = vld [vmem:[%s1677_s5 + $0x68] sm:$0xff] }
 0x599   : > { %v693_v41 = vmul.f32 %v1172_v24, %v691_v40  ;;  %931 = vmatpush.msrb.mxu2 %v896_v15  ;;  %v888_v24 = vld [vmem:[%s1677_s5 + $0x28] sm:$0xff]  ;;  %v977_v40 = vld [vmem:[%s1678_s6 + $0x70] sm:$0xff] }
 0x59a   : > { %852 = vmatpush.msrb.mxu3 %v832_v60 }
 0x59b   : > { %1091 = vmatmul.msk.f32.vlgmr.msra.gmra.mxu3 %vm401_vm5, %v693_v41  ;;  %932 = vmatpush.msrb.mxu2 %v894_v18  ;;  %v976_v41 = vld [vmem:[%s1678_s6 + $0x68] sm:$0xff] }
 0x59c   : > { %853 = vmatpush.msrb.mxu3 %v831_v61 }
 0x59d   : > { %933 = vmatpush.msrb.mxu2 %v892_v20 }
 0x59e   : > { %854 = vmatpush.msrb.mxu3 %v830_v62 }
 0x59f   : > { %934 = vmatpush.msrb.mxu2 %v890_v22 }
 0x5a0   : > { %v772_v42 = vpop.xlane.xlu0 %771  ;;  %855 = vmatpush.msrb.mxu3 %v829_v63 }
 0x5a1   : > { %1177 = vrcp.f32 %v772_v42  ;;  %v784_v46 = vand.u32 2147483648, %v772_v42  ;;  %v782_v48 = vand.u32 2147483647, %v772_v42  ;;  %vm778_vm8 = vweird.f32 %v772_v42  ;;  %935 = vmatpush.msrb.mxu2 %v888_v24 }
 0x5a3   : > { %v785_v50 = vor.u32 1.1754944e-38, %v784_v46  ;;  %vm783_vm10 = vcmp.eq.f32.partialorder %v782_v48, 8.507059e+37  ;;  %936 = vmatpush.msrb.mxu2 %v886_v26  ;;  %v971_v46 = vld [vmem:[%s1678_s6 + $0x40] sm:$0xff]  ;;  %v969_v48 = vld [vmem:[%s1678_s6 + $0x30] sm:$0xff] }
 0x5a5   : > { %937 = vmatpush.msrb.mxu2 %v884_v28 }
 0x5a7   : > { %v1178_v43 = vpop.eup %1177 }
 0x5a8   : > { %v774_v44 = vmul.f32 %v1178_v43, %v772_v42  ;;  %vm779_vm7 = vweird.f32 %v1178_v43  ;;  %v975_v42 = vld [vmem:[%s1678_s6 + $0x60] sm:$0xff] }
 0x5a9   : > { %vm780_vm9 = vmor %vm778_vm8, %vm779_vm7 }
 0x5aa   : > { %v775_v45 = vsub.f32 1.0, %v774_v44  ;;  %v973_v44 = vld [vmem:[%s1678_s6 + $0x50] sm:$0xff] }
 0x5ac   : > { %v776_v47 = vmul.f32 %v1178_v43, %v775_v45  ;;  %v972_v45 = vld [vmem:[%s1678_s6 + $0x48] sm:$0xff] }
 0x5ae   : > { %v777_v49 = vadd.f32 %v1178_v43, %v776_v47  ;;  %v970_v47 = vld [vmem:[%s1678_s6 + $0x38] sm:$0xff] }
 0x5b0   : > { %v781_v51 = vsel %vm780_vm9, %v1178_v43, %v777_v49  ;;  %v974_v43 = vld [vmem:[%s1678_s6 + $0x58] sm:$0xff]  ;;  %v968_v49 = vld [vmem:[%s1678_s6 + $0x28] sm:$0xff] }
 0x5b1   : > { %v786_v52 = vsel %vm783_vm10, %v785_v50, %v781_v51  ;;  %v967_v50 = vld [vmem:[%s1678_s6 + $0x20] sm:$0xff]  ;;  %v966_v51 = vld [vmem:[%s1678_s6 + $0x18] sm:$0xff] }
 0x5b2   : > { %v788_v53 = vmul.f32 %v1174_v29, %v786_v52  ;;  %v965_v52 = vld [vmem:[%s1678_s6 + $0x10] sm:$0xff] }
 0x5b4   : > { %1094 = vmatmul.msk.f32.vlgmr.msra.gmra.mxu1 %vm401_vm5, %v788_v53  ;;  %vm825_vm5 = vcmask 261120   ;;  %v964_v53 = vld [vmem:[%s1678_s6 + $0x8] sm:$0xff] }
 0x61e   : > { %v717_v58 = vpop.f32.mrf.mxu3 }
 0x61f   : > { %817 = vrot.lane.b32.xlu1 %v717_v58, %s1261_s25  ;;  %s1012_s25 = scalar_lea.hbm %s1681_s9, %s1100_s28 }
 0x620   : > { %s1016_s17 = sshll.u32 %s1012_s25, 4  ;;  %s1017_s17 = int_to_ptr.hbm [resolvable:$true] %s1016_s17 }
 0x621   : > { %s1199_s24 = sshra.s32 %s1017_s17, 4  ;;  %s1200_s24 = int_to_ptr.hbm [resolvable:$true] %s1199_s24 }
 0x622   : > { %s1201_s21 = scalar_lea.hbm %s1200_s24, 8  ;;  %p1206_p0 = scmp.lt.s32.totalorder %s1200_s24, %s1681_s9 }
 0x623   : > { %p1202_p11 = scmp.ne.s32.totalorder %s1200_s24, %s1201_s21 }
 0x625   : > { %p1203_p12 = pnand %p1202_p11, %p1352_p5 }
 0x627   : > { %p1204_p13 = pneg %p1203_p12 }
 0x631   : > { %v809_v59 = vpop.f32.mrf.mxu1 }
 0x632   : > { %821 = vrot.lane.b32.xlu2 %v809_v59, %s1262_s27  ;;  %s323_s27 = scalar_lea.vmem [#allocation2], %s1080_s26  ;;  %s1205_s26 = scalar_lea.hbm %s1681_s9, 16 }
 0x633   : > { %s1014_s16 = sshll.u32 %s323_s27, 4  ;;  %p1207_p1 = scmp.lt.s32.totalorder %s1205_s26, %s1201_s21  ;;  %s1015_s16 = int_to_ptr.vmem [resolvable:$true] %s1014_s16 }
 0x635   : > { %p1208_p2 = por %p1207_p1, %p1206_p0 }
 0x637   : > { %p1209_p3 = pnand %p1208_p2, %p1204_p13 }
 0x68c   : > { %v822_v4 = vpop.permute.xlu2 %821 }
 0x691   : > { %v818_v3 = vpop.permute.xlu1 %817 }
 0x692   : > { %v826_v5 = vsel %vm825_vm5, %v824_v2, %v818_v3 }
 0x693   : > { %v828_v6 = vsel %vm827_vm11, %v826_v5, %v822_v4 }
 0x694   : > { %1095 = vmatmul.msk.f32.vlgmr.msrb.gmra.mxu3 %vm330_vm0, %v828_v6 }
 0x717   : > { %v857_v7 = vpop.f32.mrf.mxu3 }
 0x718   : > { %v1530_v8 = vadd.f32 %v857_v7, %v1367_v0  ;;  %v895_v0 = vld [vmem:[%s1677_s5 + $0x60] sm:$0xff] }
 0x719   : > { %911 = vmatpush.msra.mxu0 %v895_v0 }
 0x71a   : > { %v861_v9 = vmul.f32 %v1530_v8, %v1530_v8 }
 0x71b   : > { %912 = vmatpush.msra.mxu0 %v893_v16 }
 0x71c   : > { %v862_v12 = vsel %vm330_vm0, %v861_v9, 0.0 }
 0x71d   : > { %863 = vadd.xlane.f32.xlu2 %v862_v12  ;;  %913 = vmatpush.msra.mxu0 %v891_v19 }
 0x71f   : > { %914 = vmatpush.msra.mxu0 %v889_v21 }
 0x721   : > { %915 = vmatpush.msra.mxu0 %v887_v23 }
 0x723   : > { %916 = vmatpush.msra.mxu0 %v885_v25 }
 0x725   : > { %917 = vmatpush.msra.mxu0 %v883_v27 }
 0x790   : > { %v864_v29 = vpop.xlane.xlu2 %863 }
 0x791   : > { %v865_v10 = vmul.f32 %v864_v29, %v1396_v17  ;;  %v978_v17 = vld [vmem:[%s1678_s6 + $0x78] sm:$0xff] }
 0x792   : > { %979 = vmatpush.msrb.mxu1 %v978_v17 }
 0x793   : > { %v866_v11 = vadd.f32 1e-06, %v865_v10 }
 0x794   : > { %980 = vmatpush.msrb.mxu1 %v977_v40 }
 0x795   : > { %1179 = vrsqrt.f32 %v866_v11  ;;  %vm873_vm12 = vweird.f32 %v866_v11 }
 0x796   : > { %981 = vmatpush.msrb.mxu1 %v976_v41 }
 0x798   : > { %982 = vmatpush.msrb.mxu1 %v975_v42 }
 0x79a   : > { %983 = vmatpush.msrb.mxu1 %v974_v43 }
 0x79b   : > { %v1180_v30 = vpop.eup %1179 }
 0x79c   : > { %v868_v32 = vmul.f32 %v1180_v30, %v866_v11  ;;  %vm874_vm6 = vweird.f32 %v1180_v30  ;;  %984 = vmatpush.msrb.mxu1 %v973_v44 }
 0x79d   : > { %vm875_vm13 = vmor %vm873_vm12, %vm874_vm6 }
 0x79e   : > { %v869_v33 = vmul.f32 %v1180_v30, %v868_v32  ;;  %985 = vmatpush.msrb.mxu1 %v972_v45 }
 0x7a0   : > { %v870_v34 = vmul.f32 0.5, %v869_v33  ;;  %986 = vmatpush.msrb.mxu1 %v971_v46 }
 0x7a2   : > { %v871_v35 = vsub.f32 1.5, %v870_v34  ;;  %987 = vmatpush.msrb.mxu1 %v970_v47 }
 0x7a4   : > { %v872_v36 = vmul.f32 %v1180_v30, %v871_v35  ;;  %988 = vmatpush.msrb.mxu1 %v969_v48 }
 0x7a6   : > { %v876_v38 = vsel %vm875_vm13, %v1180_v30, %v872_v36  ;;  %989 = vmatpush.msrb.mxu1 %v968_v49 }
 0x7a7   : > { %v877_v31 = vmul.f32 %v876_v38, %v1530_v8 }
 0x7a8   : > { %990 = vmatpush.msrb.mxu1 %v967_v50 }
 0x7a9   : > { %v882_v39 = vmul.f32 %v1158_v37, %v877_v31 }
 0x7aa   : > { %991 = vmatpush.msrb.mxu1 %v966_v51 }
 0x7ab   : > { %1096 = vmatmul.msk.f32.vlgmr.msra.gmra.mxu0 %vm330_vm0, %v882_v39  ;;  %1097 = vmatmul.msk.f32.vlgmr.msrb.gmra.mxu2 %vm330_vm0, %v882_v39 }
 0x7ac   : > { %992 = vmatpush.msrb.mxu1 %v965_v52 }
 0x7ae   : > { %993 = vmatpush.msrb.mxu1 %v964_v53 }
 0x7b0   : > { %994 = vmatpush.msrb.mxu1 %v963_v54 }
 0x828   : > { %v919_v55 = vpop.f32.mrf.mxu0 }
 0x829   : > { %v1098_v56 = vmul.f32 -1.442695, %v919_v55 }
 0x82b   : > { %1181 = vpow2.f32 %v1098_v56 }
 0x82e   : > { %v939_v7 = vpop.f32.mrf.mxu2 }
 0x831   : > { %v1182_v57 = vpop.eup %1181 }
 0x832   : > { %v945_v58 = vadd.f32 1.0, %v1182_v57 }
 0x834   : > { %1183 = vrcp.f32 %v945_v58  ;;  %v957_v62 = vand.u32 2147483648, %v945_v58  ;;  %v955_v1 = vand.u32 2147483647, %v945_v58  ;;  %vm951_vm15 = vweird.f32 %v945_v58 }
 0x836   : > { %v958_v3 = vor.u32 1.1754944e-38, %v957_v62  ;;  %vm956_vm2 = vcmp.eq.f32.partialorder %v955_v1, 8.507059e+37 }
 0x83a   : > { %v1184_v59 = vpop.eup %1183 }
 0x83b   : > { %v947_v60 = vmul.f32 %v1184_v59, %v945_v58  ;;  %vm952_vm14 = vweird.f32 %v1184_v59 }
 0x83c   : > { %vm953_vm1 = vmor %vm951_vm15, %vm952_vm14 }
 0x83d   : > { %v948_v61 = vsub.f32 1.0, %v947_v60 }
 0x83f   : > { %v949_v63 = vmul.f32 %v1184_v59, %v948_v61 }
 0x841   : > { %v950_v2 = vadd.f32 %v1184_v59, %v949_v63 }
 0x843   : > { %v954_v4 = vsel %vm953_vm1, %v1184_v59, %v950_v2 }
 0x844   : > { %v959_v5 = vsel %vm956_vm2, %v958_v3, %v954_v4 }
 0x845   : > { %v961_v6 = vmul.f32 %v959_v5, %v919_v55 }
 0x847   : > { %v962_v9 = vmul.f32 %v961_v6, %v939_v7 }
 0x849   : > { %995 = vmatmul.f32.vlgmr.msrb.gmra.mxu1 %v962_v9 }
 0x8c6   : > { %v996_v12 = vpop.f32.mrf.mxu1 }
 0x8c7   : > { %v999_v13 = vadd.f32 %v996_v12, %v1530_v8 }
 0x8c9   : > { %1000 = vst.msk [vmem:[%s323_s27] sm:$0xff] %vm330_vm0, %v999_v13 }
 0x8ca   : > { %1212 = shalt.err (!%p1209_p3)
}
 0x8cb   : > { %1103 = dma.vmem_to_hbm [thread:$0]  (%p1352_p5), %s1015_s16, 128, %s1017_s17, %s1002_s23  }
 0x8cc PF: > { %p1109_p4 = scmp.ge.s32.totalorder %s1247_s12, 2  ;;  %s1028_s22 = sand.u32 1, %s1235_s30  }
 0x8cd   : > { %s1029_s25 = scalar_lea.sflag [#allocation3], %s1028_s22 }
 0x8ce   : > { %p1106_p7 = pnand %p1109_p4, %p1356_p6 }
 0x8d0   : > { %p1107_p8 = pneg %p1106_p7 }
 0x8d2   : > { %1230 = dma.done.wait (%p1107_p8), %s1029_s25, 128  }
 0x8d3   : > { %1232 = vsyncadd (%p1107_p8), %s1029_s25, 4294967168  ;;  %p19_p9 = scmp.ge.s32.totalorder %s1339_s15, 4   ;;  %s1684_s30 = smov %s1239_s10 }
 0x8d4   : > { %s1685_s10 = smov %s1243_s11  ;;  %s1686_s11 = smov %s1350_s18 }
 0x8d5   : > { %s1687_s12 = smov %s1339_s15  ;;  %21 = sbr.rel (!%p19_p9) target bundleno = 3 (0x3), region = 91 }
 0x8da   :  { %1035 = vsyncpa [#allocation3], 1 }
 0x8db   :  { %1037 = vsyncpa [#allocation3 + $0x1], 1 }

</bundles_post_ra>
